<compile_context>
chip_gen: v5e
topology: v5e:2x2
jax: 0.10.0
libtpu: 0.0.40
codegen_flags: <defaults>
</compile_context>

<pallas_src>
import math

import jax
import jax.numpy as jnp
from jax.experimental import pallas as pl
from jax.experimental.pallas import tpu as pltpu


def _cdiv(a, b):
    return -(-a // b)


def _round_up(a, b):
    return _cdiv(a, b) * b


def _masked_l1_log_kernel(p_ref, t_ref, out_ref, acc_ref):
    r = pl.program_id(1)

    @pl.when(r == 0)
    def _():
        acc_ref[...] = jnp.zeros_like(acc_ref)

    # Upcast after the load so HBM traffic stays at the native input width.
    t = t_ref[...].astype(jnp.float32)                              # (TR, 128)
    p = jnp.where(t > 0.0, p_ref[...].astype(jnp.float32), 0.0)     # pred * valid_mask

    # Elementwise |log(target) - log(pred*mask)|, accumulated into the vector
    # accumulator (pure VPU + EUP; no per-step cross-lane reduction).
    acc_ref[...] += jnp.abs(jnp.log(t) - jnp.log(p))

    @pl.when(r == pl.num_programs(1) - 1)
    def _():
        # Single cross-lane/sublane reduction, only in the epilogue.
        out_ref[...] = jnp.sum(acc_ref[...]).reshape(1, 1)


def masked_l1_log_loss(pred, target, weight=None, *,
                       row_tile=None, num_partitions=2, lanes=128):
    """Pallas TPU implementation of MaskedL1LogLoss.forward.

    pred/target: same shape, any rank (module is elementwise + global mean).
    `weight` is accepted and ignored, exactly like the PyTorch forward.
    """
    del weight  # unused in the reference PyTorch forward
    assert pred.ndim == target.ndim, "inconsistent dimensions"
    assert pred.shape == target.shape

    total = math.prod(pred.shape)
    itemsize = jnp.dtype(pred.dtype).itemsize
    G = max(1, int(num_partitions))

    # Tile the flattened element stream as (rows, 128): every vreg fully dense.
    rows = _cdiv(total, lanes)
    rows8 = _round_up(rows, 8)

    if row_tile is None:
        # ~1 MiB per input block: 2 inputs x 2 pipeline buffers + f32 accumulator
        # stays well inside the scoped-VMEM budget of v5e/v6e/v7x.
        row_tile = ((1 << 20) // (lanes * itemsize)) // 8 * 8
    # Don't allocate bigger tiles than each core's share of the work needs.
    row_tile = min(int(row_tile), _round_up(_cdiv(rows8, G), 8))
    row_tile = max(8, (row_tile // 8) * 8)

    tiles_per_core = _cdiv(rows8, G * row_tile)
    rows_pad = G * tiles_per_core * row_tile
    n_pad = rows_pad * lanes - total

    def prep(x):
        x = x.reshape(-1)                    # pure reshape — no transpose/copy
        if n_pad:
            # pad value 1.0 -> |log 1 - log 1| = 0 : contributes nothing
            x = jnp.pad(x, (0, n_pad), constant_values=1.0)
        return x.reshape(rows_pad, lanes)

    p2d = prep(pred)
    t2d = prep(target)

    in_spec = pl.BlockSpec((row_tile, lanes),
                           lambda g, r: (g * tiles_per_core + r, 0))

    partials = pl.pallas_call(
        _masked_l1_log_kernel,
        out_shape=jax.ShapeDtypeStruct((G, 1, 1), jnp.float32),
        grid_spec=pltpu.PrefetchScalarGridSpec(
            num_scalar_prefetch=0,
            grid=(G, tiles_per_core),
            in_specs=[in_spec, in_spec],
            out_specs=pl.BlockSpec((None, 1, 1), lambda g, r: (g, 0, 0)),
            scratch_shapes=[pltpu.VMEM((row_tile, lanes), jnp.float32)],
        ),
        compiler_params=pltpu.CompilerParams(
            dimension_semantics=("parallel", "arbitrary"),
            vmem_limit_bytes=32 * 1024 * 1024,
        ),
    )(p2d, t2d)

    # Combine per-core partial sums and divide by the true element count
    # (torch.mean over the whole tensor).
    return jnp.sum(partials) / jnp.float32(total)


def masked_l1_log_loss_ref(pred, target, weight=None):
    """Pure-JAX reference mirroring the PyTorch forward."""
    valid_mask = target > 0
    p = pred * valid_mask
    return jnp.mean(jnp.abs(jnp.log(target) - jnp.log(p)))


if __name__ == "__main__":
    key = jax.random.PRNGKey(0)
    k1, k2 = jax.random.split(key)

    N, C, H, W = 2, 4, 16, 16
    # strictly positive inputs (log-loss domain, as the module assumes)
    pred = jax.random.uniform(k1, (N, C, H, W), jnp.float32,
                              minval=0.1, maxval=2.0)
    target = jax.random.uniform(k2, (N, C, H, W), jnp.float32,
                                minval=0.1, maxval=2.0)

    loss = jax.block_until_ready(jax.jit(masked_l1_log_loss)(pred, target))
    ref = jax.block_until_ready(masked_l1_log_loss_ref(pred, target))

    assert jnp.allclose(loss, ref, rtol=1e-5, atol=1e-6), (loss, ref)
    print("KERNEL_OK")
</pallas_src>

<mosaic_0001>
module attributes {stable_mosaic.version = 11 : i64} {
  func.func @_masked_l1_log_kernel(%arg0: i32, %arg1: i32, %arg2: memref<8x128xf32, #tpu.memory_space<vmem>>, %arg3: memref<8x128xf32, #tpu.memory_space<vmem>>, %arg4: memref<1x1x1xf32, #tpu.memory_space<vmem>>, %arg5: memref<8x128xf32, #tpu.memory_space<vmem>>) attributes {dimension_semantics = [#tpu.dimension_semantics<parallel>, #tpu.dimension_semantics<arbitrary>], iteration_bounds = array<i64: 2, 1>, scalar_prefetch = 0 : i64, scratch_operands = 1 : i64, tpu.core_type = #tpu.core_type<tc>, window_params = [{transform_indices = @transform_0, window_bounds = array<i64: 8, 128>}, {transform_indices = @transform_1, window_bounds = array<i64: 8, 128>}, {transform_indices = @transform_2, window_bounds = array<i64: 1, 1, 1>}]} {
    %c0_i32 = arith.constant 0 : i32
    %0 = arith.cmpi eq, %arg1, %c0_i32 : i32
    %1 = arith.extui %0 : i1 to i32
    %c0_i32_0 = arith.constant 0 : i32
    %2 = arith.cmpi ne, %1, %c0_i32_0 : i32
    scf.if %2 {
      %cst_11 = arith.constant 0.000000e+00 : f32
      %19 = vector.broadcast %cst_11 : f32 to vector<8x128xf32>
      %c0_12 = arith.constant 0 : index
      %c0_13 = arith.constant 0 : index
      %20 = vector.load %arg5[%c0_12, %c0_13] : memref<8x128xf32, #tpu.memory_space<vmem>>, vector<8x128xf32>
      tpu.vector_store %arg5[%c0_12, %c0_13], %19 {strides = array<i32>} : memref<8x128xf32, #tpu.memory_space<vmem>>, vector<8x128xf32>,
    } else {
    }
    %c0 = arith.constant 0 : index
    %c0_1 = arith.constant 0 : index
    %3 = vector.load %arg3[%c0, %c0_1] : memref<8x128xf32, #tpu.memory_space<vmem>>, vector<8x128xf32>
    %cst = arith.constant 0.000000e+00 : f32
    %4 = vector.broadcast %cst : f32 to vector<8x128xf32>
    %5 = arith.cmpf ogt, %3, %4 : vector<8x128xf32>
    %c0_2 = arith.constant 0 : index
    %c0_3 = arith.constant 0 : index
    %6 = vector.load %arg2[%c0_2, %c0_3] : memref<8x128xf32, #tpu.memory_space<vmem>>, vector<8x128xf32>
    %cst_4 = arith.constant 0.000000e+00 : f32
    %7 = vector.broadcast %cst_4 : f32 to vector<8x128xf32>
    %8 = arith.select %5, %6, %7 : vector<8x128xi1>, vector<8x128xf32>
    %c0_5 = arith.constant 0 : index
    %c0_6 = arith.constant 0 : index
    %9 = vector.load %arg5[%c0_5, %c0_6] : memref<8x128xf32, #tpu.memory_space<vmem>>, vector<8x128xf32>
    %10 = math.log %3 : vector<8x128xf32>
    %11 = math.log %8 : vector<8x128xf32>
    %12 = arith.subf %10, %11 : vector<8x128xf32>
    %13 = math.absf %12 : vector<8x128xf32>
    %14 = arith.addf %9, %13 : vector<8x128xf32>
    %c0_7 = arith.constant 0 : index
    %c0_8 = arith.constant 0 : index
    %15 = vector.load %arg5[%c0_7, %c0_8] : memref<8x128xf32, #tpu.memory_space<vmem>>, vector<8x128xf32>
    tpu.vector_store %arg5[%c0_7, %c0_8], %14 {strides = array<i32>} : memref<8x128xf32, #tpu.memory_space<vmem>>, vector<8x128xf32>,
    %c0_i32_9 = arith.constant 0 : i32
    %16 = arith.cmpi eq, %arg1, %c0_i32_9 : i32
    %17 = arith.extui %16 : i1 to i32
    %c0_i32_10 = arith.constant 0 : i32
    %18 = arith.cmpi ne, %17, %c0_i32_10 : i32
    scf.if %18 {
      %c0_11 = arith.constant 0 : index
      %c0_12 = arith.constant 0 : index
      %19 = vector.load %arg5[%c0_11, %c0_12] : memref<8x128xf32, #tpu.memory_space<vmem>>, vector<8x128xf32>
      %20 = vector.shape_cast %19 : vector<8x128xf32> to vector<1x8x128xf32>
      %cst_13 = arith.constant dense<0.000000e+00> : vector<1xf32>
      %21 = vector.multi_reduction <add>, %20, %cst_13 [1, 2] : vector<1x8x128xf32> to vector<1xf32>
      %22 = vector.shape_cast %21 : vector<1xf32> to vector<1x1x1xf32>
      %23 = vector.extract %22[0, 0, 0] : f32 from vector<1x1x1xf32>
      %24 = vector.broadcast %23 : f32 to vector<1x1xf32>
      %c0_14 = arith.constant 0 : index
      %c0_15 = arith.constant 0 : index
      %c0_16 = arith.constant 0 : index
      %25 = vector.load %arg4[%c0_14, %c0_15, %c0_16] : memref<1x1x1xf32, #tpu.memory_space<vmem>>, vector<1x1x1xf32>
      %26 = vector.shape_cast %25 : vector<1x1x1xf32> to vector<1x1xf32>
      %27 = vector.shape_cast %24 : vector<1x1xf32> to vector<1x1x1xf32>
      tpu.vector_store %arg4[%c0_14, %c0_15, %c0_16], %27 {strides = array<i32>} : memref<1x1x1xf32, #tpu.memory_space<vmem>>, vector<1x1x1xf32>,
    } else {
    }
    return
  }
  func.func @transform_0(%arg0: i32, %arg1: i32) -> (i32, i32) {
    %c1_i32 = arith.constant 1 : i32
    %0 = arith.muli %arg0, %c1_i32 : i32
    %1 = arith.addi %0, %arg1 : i32
    %c0_i32 = arith.constant 0 : i32
    %c0_i32_0 = arith.constant 0 : i32
    return %1, %c0_i32 : i32, i32
  }
  func.func @transform_1(%arg0: i32, %arg1: i32) -> (i32, i32) {
    %c1_i32 = arith.constant 1 : i32
    %0 = arith.muli %arg0, %c1_i32 : i32
    %1 = arith.addi %0, %arg1 : i32
    %c0_i32 = arith.constant 0 : i32
    %c0_i32_0 = arith.constant 0 : i32
    return %1, %c0_i32 : i32, i32
  }
  func.func @transform_2(%arg0: i32, %arg1: i32) -> (i32, i32, i32) {
    %c0_i32 = arith.constant 0 : i32
    %c0_i32_0 = arith.constant 0 : i32
    %c0_i32_1 = arith.constant 0 : i32
    return %arg0, %c0_i32, %c0_i32_0 : i32, i32, i32
  }
}

</mosaic_0001>

<bundles_post_ra>
// kernel: masked_l1_log_loss.1
= control target key start
LH: loop header
LB: loop body
LE: loop exit
PB: predicated region body
PF: predicated region fallthrough
CT: control target
= control target key end

     0   :  { %s359_s9 = smov 0   ;;  %s361_s10 = smov 0   ;;  %s399_s0 = inlined_call_operand.vmem [shape: f32[16,128], index: 0, kind: input, shape index: {}]   ;;  %s400_s1 = inlined_call_operand.vmem [shape: f32[16,128], index: 1, kind: input, shape index: {}]   ;;  %s401_s2 = inlined_call_operand.vmem [shape: f32[2,1,1], index: 2, kind: output, shape index: {}]  }
   0x1   :  { %s363_s11 = smov 0  }
   0x2 LB: > { %s24_s12 = sadd.s32 1, %s338_s10  ;;  %p285_p0 = scmp.ge.s32.totalorder %s342_s11, 1  ;;  %s342_s11 = sphi %s363_s11, %s12_s11   ;;  %s338_s10 = sphi %s361_s10, %s403_s10   ;;  %s334_s9 = sphi %s359_s9, %s402_s9  }
   0x3   : > { %p26_p1 = scmp.ge.s32.totalorder %s24_s12, 2  ;;  %p140_p2 = scmp.lt.s32.totalorder %s342_s11, 3 }
   0x5   : > { %s405_s12 = smov (%p26_p1, %s24_s12), 0  ;;  %p141_p3 = pnand %p285_p0, %p140_p2 }
   0x6   : > { %p166_p4 = scmp.lt.s32.totalorder (!%p141_p3), %s334_s9, 1 }
   0x7   : > { %144 = sbr.rel (%p141_p3) target bundleno = 211 (0xd3), region = 28 }
   0xc   : > { %s407_s9 = smov (!%p166_p4, %s334_s9), 1  ;;  %vm212_vm1 = vcmask 0  }
   0xd   : > { %s286_s13 = sshll.u32 %s407_s9, 3  ;;  %s179_s22 = scalar_lea.vmem %s401_s2, %s407_s9 }
   0xe   : > { %s169_s16 = scalar_lea.vmem %s399_s0, %s286_s13  ;;  %s175_s19 = scalar_lea.vmem %s400_s1, %s286_s13 }
   0xf   : > { %v185_v0 = vld [vmem:[%s175_s19] sm:$0xff] }
  0x10   : > { %v187_v1 = vld [vmem:[%s169_s16] sm:$0xff]  ;;  %vm186_vm0 = vcmp.gt.f32.partialorder %v185_v0, 0.0  ;;  %316 = vlog2.f32 %v185_v0 }
  0x11   : > { %v188_v2 = vsel %vm186_vm0, %v187_v1, 0.0 }
  0x12   : > { %318 = vlog2.f32 %v188_v2 }
  0x16   : > { %v317_v3 = vpop.eup %316 }
  0x17   : > { %v191_v4 = vmul.f32 0.6931472, %v317_v3 }
  0x18   : > { %v319_v5 = vpop.eup %318 }
  0x19   : > { %v193_v6 = vmul.f32 0.6931472, %v319_v5 }
  0x1b   : > { %v194_v7 = vsub.f32 %v191_v4, %v193_v6 }
  0x1d   : > { %v195_v8 = vand.u32 2147483647, %v194_v7 }
  0x1f   : > { %202 = vadd.xlane.f32.xlu0 %v195_v8 }
  0x92   : > { %v203_v9 = vpop.xlane.xlu0 %202 }
  0x93   : > { %v204_v10 = vrot.slane %v203_v9, 4 }
  0x95   : > { %v205_v11 = vadd.f32 %v204_v10, %v203_v9 }
  0x97   : > { %v206_v12 = vrot.slane %v205_v11, 2 }
  0x99   : > { %v207_v13 = vadd.f32 %v206_v12, %v205_v11 }
  0x9b   : > { %v208_v14 = vrot.slane %v207_v13, 1 }
  0x9d   : > { %v209_v15 = vadd.f32 %v208_v14, %v207_v13 }
  0x9f   : > { %290 = vpush %v209_v15 }
  0xd0   : > { %s291_s23 = spop %290 }
  0xd1   : > { %v211_v16 = vstv %s291_s23 }
  0xd2   : > { %213 = vst.msk [vmem:[%s179_s22] sm:$0x1] %vm212_vm1, %v211_v16 }
  0xd3 PF: > { %s12_s11 = sadd.s32 1, %s342_s11   ;;  %s402_s9 = smov %s338_s10 }
  0xd4   : > { %p9_p5 = scmp.ge.s32.totalorder %s12_s11, 4   ;;  %s403_s10 = smov %s405_s12 }
  0xd6   :  { %11 = sbr.rel (!%p9_p5) target bundleno = 2 (0x2), region = 69 }

</bundles_post_ra>
